<compile_context>
chip_gen: v7x
topology: tpu7x:2x2x1
jax: 0.10.0
libtpu: 0.0.40
codegen_flags: <defaults>
</compile_context>

<pallas_src>
import jax
import jax.numpy as jnp
from jax.experimental import pallas as pl
from jax.experimental.pallas import tpu as pltpu

HIDDEN = 256
LANE = 128


def _round_up(x, m):
    return ((x + m - 1) // m) * m


def td3_actor_kernel(x_ref, w1_ref, b1_ref, w2_ref, b2_ref, w3_ref, b3_ref,
                     o_ref):
    # Hoisted bias reads (values, not re-broadcast per use).
    b1 = b1_ref[...]
    b2 = b2_ref[...]
    b3 = b3_ref[...]

    # Layer 1: Linear + ReLU.  bf16 MXU inputs, f32 accumulation.
    x = x_ref[...].astype(jnp.bfloat16)
    h1 = jnp.dot(x, w1_ref[...], preferred_element_type=jnp.float32) + b1
    h1 = jnp.maximum(h1, 0.0)

    # Layer 2: Linear + ReLU.
    h2 = jnp.dot(h1.astype(jnp.bfloat16), w2_ref[...],
                 preferred_element_type=jnp.float32) + b2
    h2 = jnp.maximum(h2, 0.0)

    # Layer 3: Linear + tanh (tanh lowers to the EUP).  Output N is padded to
    # a full 128 lanes so the store is an unmasked full-width vst.
    out = jnp.dot(h2.astype(jnp.bfloat16), w3_ref[...],
                  preferred_element_type=jnp.float32) + b3
    o_ref[...] = jnp.tanh(out).astype(o_ref.dtype)


def td3_actor_forward(states, params, *, tb=512):
    """states: [B, state_dim] f32.  Returns tanh(MLP(states)): [B, action_dim] f32."""
    w1, b1, w2, b2, w3, b3 = params
    B, state_dim = states.shape
    action_dim = w3.shape[1]

    # Padded / repacked shapes for MXU-friendly, lane-dense tiles.
    k_pad = _round_up(state_dim, LANE)        # K of layer 1 -> 128
    n_pad = _round_up(action_dim, LANE)       # N of layer 3 -> 128 (lane-dense stores)
    tile_b = min(tb, _round_up(B, 8))         # batch tile (multiple of 8 sublanes)
    b_pad = _round_up(B, tile_b)

    # Pad activations/weights with zeros (exact: padded K rows contribute 0,
    # padded N columns / batch rows are sliced away below).
    x = jnp.pad(states, ((0, b_pad - B), (0, k_pad - state_dim)))
    w1p = jnp.pad(w1, ((0, k_pad - state_dim), (0, 0))).astype(jnp.bfloat16)
    w2p = w2.astype(jnp.bfloat16)
    w3p = jnp.pad(w3, ((0, 0), (0, n_pad - action_dim))).astype(jnp.bfloat16)
    b3p = jnp.pad(b3, ((0, 0), (0, n_pad - action_dim)))

    grid = (b_pad // tile_b,)

    out = pl.pallas_call(
        td3_actor_kernel,
        out_shape=jax.ShapeDtypeStruct((b_pad, n_pad), jnp.float32),
        grid=grid,
        in_specs=[
            # Activations: tiled along the batch grid axis (pipelined).
            pl.BlockSpec((tile_b, k_pad), lambda i: (i, 0)),
            # Weights/biases: same block for every grid step -> VMEM-resident.
            pl.BlockSpec((k_pad, HIDDEN), lambda i: (0, 0)),
            pl.BlockSpec((1, HIDDEN), lambda i: (0, 0)),
            pl.BlockSpec((HIDDEN, HIDDEN), lambda i: (0, 0)),
            pl.BlockSpec((1, HIDDEN), lambda i: (0, 0)),
            pl.BlockSpec((HIDDEN, n_pad), lambda i: (0, 0)),
            pl.BlockSpec((1, n_pad), lambda i: (0, 0)),
        ],
        out_specs=pl.BlockSpec((tile_b, n_pad), lambda i: (i, 0)),
        compiler_params=pltpu.CompilerParams(
            dimension_semantics=("parallel",)),
    )(x, w1p, b1, w2p, b2, w3p, b3p)

    return out[:B, :action_dim]


def init_params(key, state_dim, action_dim):
    """Deterministic init mimicking PyTorch nn.Linear default:
    U(-1/sqrt(fan_in), 1/sqrt(fan_in)) for weights and biases.
    Weights stored [in, out] (so kernel computes x @ W + b)."""
    ks = jax.random.split(key, 6)

    def lin(kw, kb, fan_in, fan_out):
        bound = 1.0 / jnp.sqrt(jnp.float32(fan_in))
        w = jax.random.uniform(kw, (fan_in, fan_out), jnp.float32,
                               minval=-bound, maxval=bound)
        b = jax.random.uniform(kb, (1, fan_out), jnp.float32,
                               minval=-bound, maxval=bound)
        return w, b

    w1, b1 = lin(ks[0], ks[1], state_dim, HIDDEN)
    w2, b2 = lin(ks[2], ks[3], HIDDEN, HIDDEN)
    w3, b3 = lin(ks[4], ks[5], HIDDEN, action_dim)
    return (w1, b1, w2, b2, w3, b3)


def reference_forward(states, params):
    """Pure-f32 JAX reference (matches the PyTorch module exactly)."""
    w1, b1, w2, b2, w3, b3 = params
    h1 = jnp.maximum(states @ w1 + b1, 0.0)
    h2 = jnp.maximum(h1 @ w2 + b2, 0.0)
    return jnp.tanh(h2 @ w3 + b3)


if __name__ == "__main__":
    key = jax.random.PRNGKey(0)
    k_params, k_x, k_x2 = jax.random.split(key, 3)

    batch = 4
    state_dim = 16   # state_shape = (16,)
    action_dim = 8   # action_shape = (8,)

    params = init_params(k_params, state_dim, action_dim)
    states = jax.random.normal(k_x, (batch, state_dim), jnp.float32)

    fwd = jax.jit(td3_actor_forward)
    out = jax.block_until_ready(fwd(states, params))

    ref = reference_forward(states, params)
    assert out.shape == (batch, action_dim)
    # bf16 MXU inputs with f32 accumulation -> loose tolerance vs f32 reference.
    assert jnp.allclose(out, ref, atol=2e-2, rtol=2e-2), (
        float(jnp.max(jnp.abs(out - ref))))

    # Second check: larger, non-multiple-of-tile batch exercising the batch
    # grid (grid > 1), batch padding, and resident-weight reuse.
    batch2 = 300
    states2 = jax.random.normal(k_x2, (batch2, state_dim), jnp.float32)
    out2 = jax.block_until_ready(
        jax.jit(lambda s, p: td3_actor_forward(s, p, tb=128))(states2, params))
    ref2 = reference_forward(states2, params)
    assert out2.shape == (batch2, action_dim)
    assert jnp.allclose(out2, ref2, atol=2e-2, rtol=2e-2), (
        float(jnp.max(jnp.abs(out2 - ref2))))

    print("KERNEL_OK")
</pallas_src>

<mosaic_0001>
module attributes {stable_mosaic.version = 11 : i64} {
  func.func @td3_actor_kernel(%arg0: i32, %arg1: memref<8x128xf32, #tpu.memory_space<vmem>>, %arg2: memref<128x256xbf16, #tpu.memory_space<vmem>>, %arg3: memref<1x256xf32, #tpu.memory_space<vmem>>, %arg4: memref<256x256xbf16, #tpu.memory_space<vmem>>, %arg5: memref<1x256xf32, #tpu.memory_space<vmem>>, %arg6: memref<256x128xbf16, #tpu.memory_space<vmem>>, %arg7: memref<1x128xf32, #tpu.memory_space<vmem>>, %arg8: memref<8x128xf32, #tpu.memory_space<vmem>>) attributes {dimension_semantics = [#tpu.dimension_semantics<parallel>], iteration_bounds = array<i64: 1>, scalar_prefetch = 0 : i64, scratch_operands = 0 : i64, tpu.core_type = #tpu.core_type<tc>, window_params = [{transform_indices = @transform_0, window_bounds = array<i64: 8, 128>}, {pipeline_mode = #tpu.pipeline_mode<synchronous>, transform_indices = @transform_1, window_bounds = array<i64: 128, 256>}, {pipeline_mode = #tpu.pipeline_mode<synchronous>, transform_indices = @transform_2, window_bounds = array<i64: 1, 256>}, {pipeline_mode = #tpu.pipeline_mode<synchronous>, transform_indices = @transform_3, window_bounds = array<i64: 256, 256>}, {pipeline_mode = #tpu.pipeline_mode<synchronous>, transform_indices = @transform_4, window_bounds = array<i64: 1, 256>}, {pipeline_mode = #tpu.pipeline_mode<synchronous>, transform_indices = @transform_5, window_bounds = array<i64: 256, 128>}, {pipeline_mode = #tpu.pipeline_mode<synchronous>, transform_indices = @transform_6, window_bounds = array<i64: 1, 128>}, {transform_indices = @transform_7, window_bounds = array<i64: 8, 128>}]} {
    %c0 = arith.constant 0 : index
    %c0_0 = arith.constant 0 : index
    %0 = vector.load %arg3[%c0, %c0_0] : memref<1x256xf32, #tpu.memory_space<vmem>>, vector<1x256xf32>
    %c0_1 = arith.constant 0 : index
    %c0_2 = arith.constant 0 : index
    %1 = vector.load %arg5[%c0_1, %c0_2] : memref<1x256xf32, #tpu.memory_space<vmem>>, vector<1x256xf32>
    %c0_3 = arith.constant 0 : index
    %c0_4 = arith.constant 0 : index
    %2 = vector.load %arg7[%c0_3, %c0_4] : memref<1x128xf32, #tpu.memory_space<vmem>>, vector<1x128xf32>
    %c0_5 = arith.constant 0 : index
    %c0_6 = arith.constant 0 : index
    %3 = vector.load %arg1[%c0_5, %c0_6] : memref<8x128xf32, #tpu.memory_space<vmem>>, vector<8x128xf32>
    %4 = arith.truncf %3 : vector<8x128xf32> to vector<8x128xbf16>
    %c0_7 = arith.constant 0 : index
    %c0_8 = arith.constant 0 : index
    %5 = vector.load %arg2[%c0_7, %c0_8] : memref<128x256xbf16, #tpu.memory_space<vmem>>, vector<128x256xbf16>
    %cst = arith.constant dense<0.000000e+00> : vector<8x256xf32>
    %6 = tpu.matmul %4, %5, %cst {dimension_numbers = #tpu.dot_dimension_numbers<[1], [0], [0], [1], [0, 0, 1, 1], [], []>} : vector<8x128xbf16>, vector<128x256xbf16>, vector<8x256xf32> -> vector<8x256xf32>
    %7 = vector.broadcast %0 : vector<1x256xf32> to vector<8x256xf32>
    %8 = arith.addf %6, %7 : vector<8x256xf32>
    %cst_9 = arith.constant 0.000000e+00 : f32
    %9 = vector.broadcast %cst_9 : f32 to vector<8x256xf32>
    %10 = arith.maximumf %8, %9 : vector<8x256xf32>
    %11 = arith.truncf %10 : vector<8x256xf32> to vector<8x256xbf16>
    %c0_10 = arith.constant 0 : index
    %c0_11 = arith.constant 0 : index
    %12 = vector.load %arg4[%c0_10, %c0_11] : memref<256x256xbf16, #tpu.memory_space<vmem>>, vector<256x256xbf16>
    %cst_12 = arith.constant dense<0.000000e+00> : vector<8x256xf32>
    %13 = tpu.matmul %11, %12, %cst_12 {dimension_numbers = #tpu.dot_dimension_numbers<[1], [0], [0], [1], [0, 0, 1, 1], [], []>} : vector<8x256xbf16>, vector<256x256xbf16>, vector<8x256xf32> -> vector<8x256xf32>
    %14 = vector.broadcast %1 : vector<1x256xf32> to vector<8x256xf32>
    %15 = arith.addf %13, %14 : vector<8x256xf32>
    %cst_13 = arith.constant 0.000000e+00 : f32
    %16 = vector.broadcast %cst_13 : f32 to vector<8x256xf32>
    %17 = arith.maximumf %15, %16 : vector<8x256xf32>
    %18 = arith.truncf %17 : vector<8x256xf32> to vector<8x256xbf16>
    %c0_14 = arith.constant 0 : index
    %c0_15 = arith.constant 0 : index
    %19 = vector.load %arg6[%c0_14, %c0_15] : memref<256x128xbf16, #tpu.memory_space<vmem>>, vector<256x128xbf16>
    %cst_16 = arith.constant dense<0.000000e+00> : vector<8x128xf32>
    %20 = tpu.matmul %18, %19, %cst_16 {dimension_numbers = #tpu.dot_dimension_numbers<[1], [0], [0], [1], [0, 0, 1, 1], [], []>} : vector<8x256xbf16>, vector<256x128xbf16>, vector<8x128xf32> -> vector<8x128xf32>
    %21 = vector.broadcast %2 : vector<1x128xf32> to vector<8x128xf32>
    %22 = arith.addf %20, %21 : vector<8x128xf32>
    %23 = math.tanh %22 : vector<8x128xf32>
    %c0_17 = arith.constant 0 : index
    %c0_18 = arith.constant 0 : index
    %24 = vector.load %arg8[%c0_17, %c0_18] : memref<8x128xf32, #tpu.memory_space<vmem>>, vector<8x128xf32>
    tpu.vector_store %arg8[%c0_17, %c0_18], %23 {strides = array<i32>} : memref<8x128xf32, #tpu.memory_space<vmem>>, vector<8x128xf32>,
    return
  }
  func.func @transform_0(%arg0: i32) -> (i32, i32) {
    %c0_i32 = arith.constant 0 : i32
    %c0_i32_0 = arith.constant 0 : i32
    return %arg0, %c0_i32 : i32, i32
  }
  func.func @transform_1(%arg0: i32) -> (i32, i32) {
    %c0_i32 = arith.constant 0 : i32
    %c0_i32_0 = arith.constant 0 : i32
    %c0_i32_1 = arith.constant 0 : i32
    return %c0_i32, %c0_i32_0 : i32, i32
  }
  func.func @transform_2(%arg0: i32) -> (i32, i32) {
    %c0_i32 = arith.constant 0 : i32
    %c0_i32_0 = arith.constant 0 : i32
    %c0_i32_1 = arith.constant 0 : i32
    return %c0_i32, %c0_i32_0 : i32, i32
  }
  func.func @transform_3(%arg0: i32) -> (i32, i32) {
    %c0_i32 = arith.constant 0 : i32
    %c0_i32_0 = arith.constant 0 : i32
    %c0_i32_1 = arith.constant 0 : i32
    return %c0_i32, %c0_i32_0 : i32, i32
  }
  func.func @transform_4(%arg0: i32) -> (i32, i32) {
    %c0_i32 = arith.constant 0 : i32
    %c0_i32_0 = arith.constant 0 : i32
    %c0_i32_1 = arith.constant 0 : i32
    return %c0_i32, %c0_i32_0 : i32, i32
  }
  func.func @transform_5(%arg0: i32) -> (i32, i32) {
    %c0_i32 = arith.constant 0 : i32
    %c0_i32_0 = arith.constant 0 : i32
    %c0_i32_1 = arith.constant 0 : i32
    return %c0_i32, %c0_i32_0 : i32, i32
  }
  func.func @transform_6(%arg0: i32) -> (i32, i32) {
    %c0_i32 = arith.constant 0 : i32
    %c0_i32_0 = arith.constant 0 : i32
    %c0_i32_1 = arith.constant 0 : i32
    return %c0_i32, %c0_i32_0 : i32, i32
  }
  func.func @transform_7(%arg0: i32) -> (i32, i32) {
    %c0_i32 = arith.constant 0 : i32
    %c0_i32_0 = arith.constant 0 : i32
    return %arg0, %c0_i32 : i32, i32
  }
}

</mosaic_0001>

<bundles_post_ra>
// kernel: td3_actor_forward.1
= control target key start
LH: loop header
LB: loop body
LE: loop exit
PB: predicated region body
PF: predicated region fallthrough
CT: control target
= control target key end

     0   :  { %v790_v1 = vmov 0   ;;  %v49_v63 = vlaneseq  ;;  %s1038_s1 = inlined_call_operand.vmem [shape: bf16[128,256], index: 1, kind: input, shape index: {}]   ;;  %s1039_s3 = inlined_call_operand.vmem [shape: bf16[256,256], index: 3, kind: input, shape index: {}]   ;;  %s1040_s0 = inlined_call_operand.vmem [shape: f32[8,128], index: 0, kind: input, shape index: {}]   ;;  %s1041_s5 = inlined_call_operand.vmem [shape: bf16[256,128], index: 5, kind: input, shape index: {}]   ;;  %s1042_s2 = inlined_call_operand.vmem [shape: f32[1,256], index: 2, kind: input, shape index: {}]   ;;  %s1043_s4 = inlined_call_operand.vmem [shape: f32[1,256], index: 4, kind: input, shape index: {}]   ;;  %s1044_s6 = inlined_call_operand.vmem [shape: f32[1,128], index: 6, kind: input, shape index: {}]   ;;  %s1045_s7 = inlined_call_operand.vmem [shape: f32[8,128], index: 7, kind: output, shape index: {}]  }
   0x1   :  { %v700_v0 = vld [vmem:[%s1038_s1 + $0x4] ss:$8 sps:$4 sm:$0xff]   ;;  %171 = vmatprep.mubr.bf16.mxu0 %v790_v1  ;;  %v702_v2 = vld [vmem:[%s1038_s1] ss:$8 sps:$4 sm:$0xff]   ;;  %v703_v3 = vld [vmem:[%s1038_s1 + $0x14] ss:$8 sps:$4 sm:$0xff]  }
   0x2   :  { %139 = vmatprep.subr.bf16.mxu0 %v700_v0  ;;  %v705_v4 = vld [vmem:[%s1038_s1 + $0x10] ss:$8 sps:$4 sm:$0xff]   ;;  %v706_v5 = vld [vmem:[%s1038_s1 + $0x24] ss:$8 sps:$4 sm:$0xff]   ;;  %v708_v6 = vld [vmem:[%s1038_s1 + $0x20] ss:$8 sps:$4 sm:$0xff]  }
   0x3   :  { %140 = vmatpush1.bf16.msra.mxu0 %v702_v2  ;;  %v709_v7 = vld [vmem:[%s1038_s1 + $0x34] ss:$8 sps:$4 sm:$0xff]   ;;  %v711_v8 = vld [vmem:[%s1038_s1 + $0x30] ss:$8 sps:$4 sm:$0xff]   ;;  %v712_v9 = vld [vmem:[%s1038_s1 + $0x44] ss:$8 sps:$4 sm:$0xff]  }
   0x4   :  { %141 = vmatprep.subr.bf16.mxu0 %v703_v3  ;;  %v724_v10 = vld [vmem:[%s1039_s3 + $0x4] ss:$8 sps:$4 sm:$0xff]   ;;  %v726_v11 = vld [vmem:[%s1039_s3] ss:$8 sps:$4 sm:$0xff]   ;;  %v727_v12 = vld [vmem:[%s1039_s3 + $0x14] ss:$8 sps:$4 sm:$0xff]  }
   0x5   :  { %387 = vmatprep.subr.bf16.mxu1 %v724_v10  ;;  %v714_v13 = vld [vmem:[%s1038_s1 + $0x40] ss:$8 sps:$4 sm:$0xff]   ;;  %v729_v14 = vld [vmem:[%s1039_s3 + $0x10] ss:$8 sps:$4 sm:$0xff]   ;;  %v730_v15 = vld [vmem:[%s1039_s3 + $0x24] ss:$8 sps:$4 sm:$0xff]  }
   0x6   :  { %388 = vmatpush1.bf16.msra.mxu1 %v726_v11  ;;  %v715_v16 = vld [vmem:[%s1038_s1 + $0x54] ss:$8 sps:$4 sm:$0xff]   ;;  %v717_v17 = vld [vmem:[%s1038_s1 + $0x50] ss:$8 sps:$4 sm:$0xff]   ;;  %v732_v18 = vld [vmem:[%s1039_s3 + $0x20] ss:$8 sps:$4 sm:$0xff]  }
   0x7   :  { %142 = vmatpush1.bf16.msra.mxu0 %v705_v4  ;;  %389 = vmatprep.subr.bf16.mxu1 %v727_v12  ;;  %v733_v19 = vld [vmem:[%s1039_s3 + $0x34] ss:$8 sps:$4 sm:$0xff]   ;;  %v718_v20 = vld [vmem:[%s1038_s1 + $0x64] ss:$8 sps:$4 sm:$0xff]   ;;  %v720_v21 = vld [vmem:[%s1038_s1 + $0x60] ss:$8 sps:$4 sm:$0xff]  }
   0x8   :  { %143 = vmatprep.subr.bf16.mxu0 %v706_v5  ;;  %v735_v22 = vld [vmem:[%s1039_s3 + $0x30] ss:$8 sps:$4 sm:$0xff]   ;;  %v736_v23 = vld [vmem:[%s1039_s3 + $0x44] ss:$8 sps:$4 sm:$0xff]   ;;  %v721_v24 = vld [vmem:[%s1038_s1 + $0x74] ss:$8 sps:$4 sm:$0xff]  }
   0x9   :  { %v723_v25 = vld [vmem:[%s1038_s1 + $0x70] ss:$8 sps:$4 sm:$0xff]   ;;  %v30_v26 = vld [vmem:[%s1040_s0] sm:$0xff]  ;;  %v739_v28 = vld [vmem:[%s1039_s3 + $0x54] ss:$8 sps:$4 sm:$0xff]   ;;  %v50_v0 = vshrl.u32 %v49_v63, 7 }
   0xa   :  { %390 = vmatpush1.bf16.msra.mxu1 %v729_v14  ;;  %v738_v27 = vld [vmem:[%s1039_s3 + $0x40] ss:$8 sps:$4 sm:$0xff]   ;;  %v741_v29 = vld [vmem:[%s1039_s3 + $0x50] ss:$8 sps:$4 sm:$0xff]   ;;  %v31_v30 = vpack.c.bf16 %v30_v26, %v30_v26  ;;  %v742_v31 = vld [vmem:[%s1039_s3 + $0x64] ss:$8 sps:$4 sm:$0xff]  }
   0xb   :  { %144 = vmatpush1.bf16.msra.mxu0 %v708_v6  ;;  %391 = vmatprep.subr.bf16.mxu1 %v730_v15  ;;  %v744_v32 = vld [vmem:[%s1039_s3 + $0x60] ss:$8 sps:$4 sm:$0xff]   ;;  %v745_v33 = vld [vmem:[%s1039_s3 + $0x74] ss:$8 sps:$4 sm:$0xff]   ;;  %v747_v34 = vld [vmem:[%s1039_s3 + $0x70] ss:$8 sps:$4 sm:$0xff]  }
   0xc   :  { %145 = vmatprep.subr.bf16.mxu0 %v709_v7  ;;  %v748_v35 = vld [vmem:[%s1039_s3 + $0x84] ss:$8 sps:$4 sm:$0xff]   ;;  %v750_v36 = vld [vmem:[%s1039_s3 + $0x80] ss:$8 sps:$4 sm:$0xff]   ;;  %v751_v37 = vld [vmem:[%s1039_s3 + $0x94] ss:$8 sps:$4 sm:$0xff]  }
   0xd   :  { %v753_v38 = vld [vmem:[%s1039_s3 + $0x90] ss:$8 sps:$4 sm:$0xff]   ;;  %v754_v39 = vld [vmem:[%s1039_s3 + $0xa4] ss:$8 sps:$4 sm:$0xff]   ;;  %v756_v40 = vld [vmem:[%s1039_s3 + $0xa0] ss:$8 sps:$4 sm:$0xff]  }
   0xe   :  { %392 = vmatpush1.bf16.msra.mxu1 %v732_v18  ;;  %v757_v41 = vld [vmem:[%s1039_s3 + $0xb4] ss:$8 sps:$4 sm:$0xff]   ;;  %v759_v42 = vld [vmem:[%s1039_s3 + $0xb0] ss:$8 sps:$4 sm:$0xff]   ;;  %v760_v43 = vld [vmem:[%s1039_s3 + $0xc4] ss:$8 sps:$4 sm:$0xff]  }
   0xf   :  { %146 = vmatpush1.bf16.msra.mxu0 %v711_v8  ;;  %393 = vmatprep.subr.bf16.mxu1 %v733_v19  ;;  %v762_v44 = vld [vmem:[%s1039_s3 + $0xc0] ss:$8 sps:$4 sm:$0xff]   ;;  %v763_v45 = vld [vmem:[%s1039_s3 + $0xd4] ss:$8 sps:$4 sm:$0xff]   ;;  %v765_v46 = vld [vmem:[%s1039_s3 + $0xd0] ss:$8 sps:$4 sm:$0xff]  }
  0x10   :  { %147 = vmatprep.subr.bf16.mxu0 %v712_v9  ;;  %v766_v47 = vld [vmem:[%s1039_s3 + $0xe4] ss:$8 sps:$4 sm:$0xff]   ;;  %v768_v48 = vld [vmem:[%s1039_s3 + $0xe0] ss:$8 sps:$4 sm:$0xff]   ;;  %v769_v49 = vld [vmem:[%s1039_s3 + $0xf4] ss:$8 sps:$4 sm:$0xff]  }
  0x11   :  { %v771_v50 = vld [vmem:[%s1039_s3 + $0xf0] ss:$8 sps:$4 sm:$0xff]   ;;  %v772_v51 = vld [vmem:[%s1041_s5 + $0x40] sm:$0xff]   ;;  %v774_v53 = vld [vmem:[%s1041_s5 + $0x48] sm:$0xff]   ;;  %v51_v1 = vsub.s32 0, %v50_v0  ;;  %v55_v3 = vsub.s32 1, %v50_v0 }
  0x12   :  { %394 = vmatpush1.bf16.msra.mxu1 %v735_v22  ;;  %v773_v52 = vld [vmem:[%s1041_s5] sm:$0xff]   ;;  %v775_v54 = vld [vmem:[%s1041_s5 + $0x8] sm:$0xff]   ;;  %v776_v55 = vld [vmem:[%s1041_s5 + $0x50] sm:$0xff]  }
  0x13   :  { %148 = vmatpush1.bf16.msra.mxu0 %v714_v13  ;;  %395 = vmatprep.subr.bf16.mxu1 %v736_v23  ;;  %v777_v56 = vld [vmem:[%s1041_s5 + $0x10] sm:$0xff]   ;;  %v778_v57 = vld [vmem:[%s1041_s5 + $0x58] sm:$0xff]   ;;  %v780_v59 = vld [vmem:[%s1041_s5 + $0x60] sm:$0xff]  }
  0x14   :  { %149 = vmatprep.subr.bf16.mxu0 %v715_v16  ;;  %v779_v58 = vld [vmem:[%s1041_s5 + $0x18] sm:$0xff]   ;;  %v781_v60 = vld [vmem:[%s1041_s5 + $0x20] sm:$0xff]   ;;  %v782_v61 = vld [vmem:[%s1041_s5 + $0x68] sm:$0xff]  }
  0x15   :  { %v783_v62 = vld [vmem:[%s1041_s5 + $0x28] sm:$0xff]   ;;  %v27_v2 = vld [vmem:[%s1042_s2] sm:$0x3]  ;;  %v784_v16 = vld [vmem:[%s1041_s5 + $0x70] sm:$0xff]  }
  0x16   :  { %396 = vmatpush1.bf16.msra.mxu1 %v738_v27  ;;  %v52_v4 = vrot.slane %v27_v2, %v51_v1  ;;  %v56_v5 = vrot.slane %v27_v2, %v55_v3  ;;  %v786_v18 = vld [vmem:[%s1041_s5 + $0x78] sm:$0xff]  }
  0x17   :  { %150 = vmatpush1.bf16.msra.mxu0 %v717_v17  ;;  %397 = vmatprep.subr.bf16.mxu1 %v739_v28  ;;  %v785_v17 = vld [vmem:[%s1041_s5 + $0x30] sm:$0xff]   ;;  %v787_v19 = vld [vmem:[%s1041_s5 + $0x38] sm:$0xff]  }
  0x18   :  { %151 = vmatprep.subr.bf16.mxu0 %v718_v20  ;;  %v28_v20 = vld [vmem:[%s1043_s4] sm:$0x3] }
  0x19   :  { %v224_v22 = vrot.slane %v28_v20, %v55_v3 }
  0x1a   :  { %398 = vmatpush1.bf16.msra.mxu1 %v741_v29 }
  0x1b   :  { %152 = vmatpush1.bf16.msra.mxu0 %v720_v21  ;;  %399 = vmatprep.subr.bf16.mxu1 %v742_v31  ;;  %v220_v21 = vrot.slane %v28_v20, %v51_v1 }
  0x1c   :  { %153 = vmatprep.subr.bf16.mxu0 %v721_v24 }
  0x1e   :  { %400 = vmatpush1.bf16.msra.mxu1 %v744_v32 }
  0x1f   :  { %154 = vmatpush1.bf16.msra.mxu0 %v723_v25  ;;  %401 = vmatprep.subr.bf16.mxu1 %v745_v33 }
  0x20   :  { %677 = vmatprep.subr.bf16.mxu0 %v772_v51 }
  0x22   :  { %172 = vmatmul.mubr.bf16.vlgmr.msra.gmra.mrb[0].mxu0 %v31_v30  ;;  %402 = vmatpush1.bf16.msra.mxu1 %v747_v34  ;;  %v660_v34 = vld [vmem:[%s1044_s6] ss:$0 sm:$0xff] }
  0x23   :  { %403 = vmatprep.subr.bf16.mxu1 %v748_v35  ;;  %678 = vmatpush3.bf16.msra.mxu0 %v773_v52 }
  0x24   :  { %679 = vmatprep.subr.bf16.mxu0 %v774_v53 }
  0x26   :  { %404 = vmatpush1.bf16.msra.mxu1 %v750_v36 }
  0x27   :  { %405 = vmatprep.subr.bf16.mxu1 %v751_v37  ;;  %680 = vmatpush3.bf16.msra.mxu0 %v775_v54 }
  0x28   :  { %681 = vmatprep.subr.bf16.mxu0 %v776_v55 }
  0x2a   :  { %406 = vmatpush1.bf16.msra.mxu1 %v753_v38 }
  0x2b   :  { %407 = vmatprep.subr.bf16.mxu1 %v754_v39  ;;  %682 = vmatpush3.bf16.msra.mxu0 %v777_v56 }
  0x2c   :  { %683 = vmatprep.subr.bf16.mxu0 %v778_v57 }
  0x2e   :  { %408 = vmatpush1.bf16.msra.mxu1 %v756_v40 }
  0x2f   :  { %409 = vmatprep.subr.bf16.mxu1 %v757_v41  ;;  %684 = vmatpush3.bf16.msra.mxu0 %v779_v58 }
  0x30   :  { %685 = vmatprep.subr.bf16.mxu0 %v780_v59 }
  0x32   :  { %410 = vmatpush1.bf16.msra.mxu1 %v759_v42 }
  0x33   :  { %411 = vmatprep.subr.bf16.mxu1 %v760_v43  ;;  %686 = vmatpush3.bf16.msra.mxu0 %v781_v60 }
  0x34   :  { %687 = vmatprep.subr.bf16.mxu0 %v782_v61 }
  0x36   :  { %412 = vmatpush1.bf16.msra.mxu1 %v762_v44 }
  0x37   :  { %413 = vmatprep.subr.bf16.mxu1 %v763_v45  ;;  %688 = vmatpush3.bf16.msra.mxu0 %v783_v62 }
  0x38   :  { %689 = vmatprep.subr.bf16.mxu0 %v784_v16 }
  0x3a   :  { %414 = vmatpush1.bf16.msra.mxu1 %v765_v46 }
  0x3b   :  { %415 = vmatprep.subr.bf16.mxu1 %v766_v47  ;;  %690 = vmatpush3.bf16.msra.mxu0 %v785_v17 }
  0x3c   :  { %691 = vmatprep.subr.bf16.mxu0 %v786_v18 }
  0x3e   :  { %416 = vmatpush1.bf16.msra.mxu1 %v768_v48 }
  0x3f   :  { %417 = vmatprep.subr.bf16.mxu1 %v769_v49  ;;  %692 = vmatpush3.bf16.msra.mxu0 %v787_v19 }
  0x42   :  { %418 = vmatpush1.bf16.msra.mxu1 %v771_v50 }
  0xf5   :  { %v173_v6 = vpop.f32.mrb[0].mxu0 }
  0xf6   :  { %v174_v7 = vadd.f32 %v173_v6, %v52_v4  ;;  %v175_v8 = vpop.f32.mrb[1].mxu0 }
  0xf7   :  { %v176_v9 = vadd.f32 %v175_v8, %v56_v5  ;;  %v177_v10 = vpop.f32.mrb[2].mxu0 }
  0xf8   :  { %v180_v11 = vmax.f32 %v174_v7, 0.0  ;;  %v178_v12 = vpop.f32.mrb[3].mxu0 }
  0xf9   :  { %v181_v13 = vmax.f32 %v176_v9, 0.0 }
  0xfa   :  { %v182_v15 = vpack.c.bf16 %v180_v11, %v180_v11 }
  0xfb   :  { %v183_v14 = vpack.c.bf16 %v181_v13, %v181_v13 }
  0xfd   :  { %419 = vmatprep.mubr.bf16.mxu1 %v183_v14 }
  0xfe   :  { %420 = vmatmul.mubr.bf16.vlgmr.msra.gmra.mrb[0].mxu1 %v182_v15 }
 0x1d1   :  { %v421_v23 = vpop.f32.mrb[0].mxu1 }
 0x1d2   :  { %v422_v24 = vadd.f32 %v421_v23, %v220_v21  ;;  %v423_v25 = vpop.f32.mrb[1].mxu1 }
 0x1d3   :  { %v424_v26 = vadd.f32 %v423_v25, %v224_v22  ;;  %v425_v27 = vpop.f32.mrb[2].mxu1 }
 0x1d4   :  { %v428_v28 = vmax.f32 %v422_v24, 0.0  ;;  %v426_v29 = vpop.f32.mrb[3].mxu1 }
 0x1d5   :  { %v429_v30 = vmax.f32 %v424_v26, 0.0 }
 0x1d6   :  { %v430_v32 = vpack.c.bf16 %v428_v28, %v428_v28 }
 0x1d7   :  { %v431_v31 = vpack.c.bf16 %v429_v30, %v429_v30 }
 0x1d9   :  { %598 = vmatprep.mubr.bf16.mxu0 %v431_v31 }
 0x1da   :  { %599 = vmatmul.mubr.bf16.vlgmr.msra.gmra.mrb[4].mxu0 %v430_v32 }
 0x2ad   :  { %v693_v33 = vpop.f32.mrb[4].mxu0 }
 0x2ae   :  { %v694_v35 = vpop.f32.mrb[5].mxu0 }
 0x2af   :  { %v695_v36 = vadd.f32 %v694_v35, %v693_v33  ;;  %v696_v37 = vpop.f32.mrb[6].mxu0 }
 0x2b0   :  { %v697_v38 = vpop.f32.mrb[7].mxu0 }
 0x2b1   :  { %v601_v39 = vadd.f32 %v695_v36, %v660_v34 }
 0x2b3   :  { %788 = vtanh.f32 %v601_v39 }
 0x2bd   :  { %v789_v40 = vpop.eup %788 }
 0x2be   :  { %607 = vst [vmem:[%s1045_s7] sm:$0xff] %v789_v40 }

</bundles_post_ra>
